<compile_context>
chip_gen: v6e
topology: v6e:2x2x1
jax: 0.10.0
libtpu: 0.0.40
codegen_flags: <defaults>
</compile_context>

<pallas_src>
import functools

import jax
import jax.numpy as jnp
import numpy as np
from jax import lax
from jax.experimental import pallas as pl
from jax.experimental.pallas import tpu as pltpu

EPS = 1e-5          # nn.InstanceNorm2d default eps
DIFF_CH = 6         # layer2 = Conv2d(8, 1, 1): 8 = mean + max + 6 diff channels
_SUBLANE = 8
_LANE = 128
# Re-derived per-batch f32 "row" count of width ~H*W: 46 double-buffered block
# rows (x 2*8 + diff 2*6 + out 2*8 + mask 2*1) + ~26 live in-body temporaries.
_ROWS_F32 = 72


# ----------------------------------------------------------------------------
# Hardware sizing
# ----------------------------------------------------------------------------
def _tpu_config():
    """Per-generation VMEM budget (bytes), scoped limit, and 2-TensorCore flag."""
    kind = ""
    try:
        kind = jax.devices()[0].device_kind.lower()
    except Exception:
        pass
    if any(g in kind for g in ("v4", "v5", "v6")):
        # Single TensorCore, 128 MiB physical VMEM: go big.
        return {"budget": 48 << 20, "vmem_limit": 96 << 20, "two_cores": False}
    # v7x (2 TCs, 64 MiB VMEM) or unknown -> conservative sizing.
    return {"budget": 20 << 20, "vmem_limit": 44 << 20, "two_cores": True}


# ----------------------------------------------------------------------------
# Kernel bodies
# ----------------------------------------------------------------------------
def _conv1x1_vpu(x_ref, w1c):
    """layer1's 1x1 conv as unrolled VPU FMAs (keeps the MXU off the path).

    x_ref: (bt, Cin, S) Ref.  w1c: (Cin, Cout, 1) f32 with w1c[c, o, 0] = W[o, c].
    Returns (bt, Cout, S) float32.  Reads x_ref one channel at a time so no
    whole-block f32 copy of x stays live across the body.
    """
    cin = x_ref.shape[1]
    proj = None
    for ci in range(cin):
        xc = x_ref[:, ci:ci + 1, :].astype(jnp.float32)      # (bt, 1, S)
        term = xc * w1c[ci][None, :, :]                      # (bt, Cout, S)
        proj = term if proj is None else proj + term
    return proj


def _layer2_and_store(projn, x_ref, diff_ref, w2d_ref, sc_ref, mask_ref, out_ref):
    """pre_mask = [mean_c, max_c, diff]; Conv2d(8,1,1) + sigmoid; out = mask*x."""
    ch_mean = jnp.mean(projn, axis=1)                        # (bt, S)
    ch_max = jnp.max(projn, axis=1)                          # (bt, S)
    dterm = jnp.sum(diff_ref[...].astype(jnp.float32) * w2d_ref[...][None, :, :],
                    axis=1)                                  # (bt, S)
    logit = sc_ref[0] * ch_mean + sc_ref[1] * ch_max + dterm + sc_ref[2]
    m = 1.0 / (1.0 + jnp.exp(-logit))                        # sigmoid (EUP exp)
    mask_ref[...] = m.astype(mask_ref.dtype)
    out_ref[...] = (m[:, None, :] * x_ref[...].astype(jnp.float32)).astype(out_ref.dtype)


def _fdf_fused_kernel(x_ref, diff_ref, w1c_ref, gamma_ref, beta_ref, w2d_ref,
                      sc_ref, mask_ref, out_ref):
    """Single-pass path: full H*W per batch tile, two-pass InstanceNorm stats."""
    hw = x_ref.shape[2]
    inv_hw = 1.0 / hw

    proj = _conv1x1_vpu(x_ref, w1c_ref[...].astype(jnp.float32))   # (bt, C, hw)

    # InstanceNorm2d (biased variance, eps=1e-5) + affine + ReLU.
    # Two-pass (centered) variance: proj is fully resident, so it is ~free and
    # avoids the E[x^2]-E[x]^2 cancellation concern.
    mean = jnp.sum(proj, axis=2, keepdims=True) * inv_hw           # (bt, C, 1)
    centered = proj - mean
    var = jnp.sum(centered * centered, axis=2, keepdims=True) * inv_hw
    scale = gamma_ref[...][:, :, None] * lax.rsqrt(var + EPS)      # (bt, C, 1)
    projn = jnp.maximum(centered * scale + beta_ref[...][:, :, None], 0.0)

    _layer2_and_store(projn, x_ref, diff_ref, w2d_ref, sc_ref, mask_ref, out_ref)


def _fdf_stats_kernel(x_ref, w1c_ref, s1_ref, s2_ref, s1_acc, s2_acc, *, hw):
    """Tiled pass 1: accumulate per-(batch, channel) spatial sums of the conv."""
    si = pl.program_id(1)
    st = x_ref.shape[2]

    @pl.when(si == 0)
    def _():
        s1_acc[...] = jnp.zeros_like(s1_acc)
        s2_acc[...] = jnp.zeros_like(s2_acc)

    proj = _conv1x1_vpu(x_ref, w1c_ref[...].astype(jnp.float32))   # (bt, C, st)
    # Lane mask for the (possibly) partial last spatial tile: OOB lanes hold
    # unspecified data and must not contaminate the InstanceNorm sums.
    lane = lax.broadcasted_iota(jnp.int32, proj.shape, 2)
    valid = (si * st + lane) < hw
    pm = jnp.where(valid, proj, 0.0)

    s1_acc[...] += jnp.sum(pm, axis=2)                             # (bt, C)
    s2_acc[...] += jnp.sum(pm * pm, axis=2)

    @pl.when(si == pl.num_programs(1) - 1)
    def _():
        s1_ref[...] = s1_acc[...]
        s2_ref[...] = s2_acc[...]


def _fdf_apply_kernel(x_ref, diff_ref, s1_ref, s2_ref, w1c_ref, gamma_ref,
                      beta_ref, w2d_ref, sc_ref, mask_ref, out_ref, *, inv_hw):
    """Tiled pass 2: recompute the cheap conv per tile, normalize, mask, filter."""
    proj = _conv1x1_vpu(x_ref, w1c_ref[...].astype(jnp.float32))   # (bt, C, st)

    s1 = s1_ref[...]                                               # (bt, C)
    s2 = s2_ref[...]
    mean = s1 * inv_hw
    # TODO(synk): one-pass E[x^2]-E[x]^2 can lose precision for large-offset
    # activations; switch to shifted moments if such inputs ever appear.
    var = jnp.maximum(s2 * inv_hw - mean * mean, 0.0)
    scale = gamma_ref[...] * lax.rsqrt(var + EPS)                  # (bt, C)
    shift = beta_ref[...] - mean * scale
    projn = jnp.maximum(proj * scale[:, :, None] + shift[:, :, None], 0.0)

    _layer2_and_store(projn, x_ref, diff_ref, w2d_ref, sc_ref, mask_ref, out_ref)


# ----------------------------------------------------------------------------
# pallas_call runners
# ----------------------------------------------------------------------------
def _prep_params(params, C):
    f32 = jnp.float32
    w1 = jnp.asarray(params["w1"], f32).reshape(C, C)
    # Weight columns laid out along sublanes: w1c[c, o, 0] = w1[o, c].
    w1c = jnp.transpose(w1)[:, :, None]                            # (Cin, Cout, 1)
    gamma = jnp.asarray(params["gamma"], f32).reshape(1, C)
    beta = jnp.asarray(params["beta"], f32).reshape(1, C)
    w2 = jnp.asarray(params["w2"], f32).reshape(2 + DIFF_CH)
    w2d = w2[2:].reshape(DIFF_CH, 1)                               # diff-channel weights
    b2 = jnp.asarray(params["b2"], f32).reshape(1)
    sc = jnp.concatenate([w2[:2], b2])                             # SMEM: [w_mean, w_max, b2]
    # NOTE: params["b1"] is intentionally unused - InstanceNorm's per-(b, c)
    # mean subtraction cancels any per-channel constant added by the 1x1 conv.
    return w1c, gamma, beta, w2d, sc


def _run_fused(x2, diff2, w1c, gamma, beta, w2d, sc, bt, vmem_limit):
    B, C, HW = x2.shape
    itemsize = x2.dtype.itemsize
    grid = (pl.cdiv(B, bt),)

    return pl.pallas_call(
        _fdf_fused_kernel,
        grid=grid,
        in_specs=[
            pl.BlockSpec((bt, C, HW), lambda i: (i, 0, 0)),
            pl.BlockSpec((bt, DIFF_CH, HW), lambda i: (i, 0, 0)),
            pl.BlockSpec((C, C, 1), lambda i: (0, 0, 0)),
            pl.BlockSpec((1, C), lambda i: (0, 0)),
            pl.BlockSpec((1, C), lambda i: (0, 0)),
            pl.BlockSpec((DIFF_CH, 1), lambda i: (0, 0)),
            pl.BlockSpec(memory_space=pltpu.MemorySpace.SMEM),
        ],
        out_specs=[
            pl.BlockSpec((bt, HW), lambda i: (i, 0)),              # 2-D, lane-dense mask
            pl.BlockSpec((bt, C, HW), lambda i: (i, 0, 0)),
        ],
        out_shape=(
            jax.ShapeDtypeStruct((B, HW), x2.dtype),
            jax.ShapeDtypeStruct((B, C, HW), x2.dtype),
        ),
        compiler_params=pltpu.CompilerParams(
            dimension_semantics=("parallel",),
            vmem_limit_bytes=int(vmem_limit)),
        cost_estimate=pl.CostEstimate(
            flops=int(B * HW * (2 * C * C + 12 * C + 32)),
            transcendentals=int(B * HW),
            bytes_accessed=int(B * HW * (2 * C + DIFF_CH + 1) * itemsize)),
    )(x2, diff2, w1c, gamma, beta, w2d, sc)


def _run_tiled(x2, diff2, w1c, gamma, beta, w2d, sc, bt, st, vmem_limit):
    B, C, HW = x2.shape
    itemsize = x2.dtype.itemsize
    nb = pl.cdiv(B, bt)
    ns = pl.cdiv(HW, st)

    # Pass 1: InstanceNorm statistics accumulated across spatial tiles.
    s1, s2 = pl.pallas_call(
        functools.partial(_fdf_stats_kernel, hw=HW),
        grid=(nb, ns),
        in_specs=[
            pl.BlockSpec((bt, C, st), lambda b, s: (b, 0, s)),
            pl.BlockSpec((C, C, 1), lambda b, s: (0, 0, 0)),
        ],
        out_specs=[
            pl.BlockSpec((bt, C), lambda b, s: (b, 0)),
            pl.BlockSpec((bt, C), lambda b, s: (b, 0)),
        ],
        out_shape=(
            jax.ShapeDtypeStruct((B, C), jnp.float32),
            jax.ShapeDtypeStruct((B, C), jnp.float32),
        ),
        scratch_shapes=[pltpu.VMEM((bt, C), jnp.float32),
                        pltpu.VMEM((bt, C), jnp.float32)],
        compiler_params=pltpu.CompilerParams(
            dimension_semantics=("parallel", "arbitrary"),
            vmem_limit_bytes=int(vmem_limit)),
        cost_estimate=pl.CostEstimate(
            flops=int(B * HW * (2 * C * C + 4 * C)),
            transcendentals=0,
            bytes_accessed=int(B * HW * C * itemsize)),
    )(x2, w1c)

    # Pass 2: recompute the cheap conv per tile, normalize, mask, filter.
    return pl.pallas_call(
        functools.partial(_fdf_apply_kernel, inv_hw=1.0 / HW),
        grid=(nb, ns),
        in_specs=[
            pl.BlockSpec((bt, C, st), lambda b, s: (b, 0, s)),
            pl.BlockSpec((bt, DIFF_CH, st), lambda b, s: (b, 0, s)),
            pl.BlockSpec((bt, C), lambda b, s: (b, 0)),
            pl.BlockSpec((bt, C), lambda b, s: (b, 0)),
            pl.BlockSpec((C, C, 1), lambda b, s: (0, 0, 0)),
            pl.BlockSpec((1, C), lambda b, s: (0, 0)),
            pl.BlockSpec((1, C), lambda b, s: (0, 0)),
            pl.BlockSpec((DIFF_CH, 1), lambda b, s: (0, 0)),
            pl.BlockSpec(memory_space=pltpu.MemorySpace.SMEM),
        ],
        out_specs=[
            pl.BlockSpec((bt, st), lambda b, s: (b, s)),
            pl.BlockSpec((bt, C, st), lambda b, s: (b, 0, s)),
        ],
        out_shape=(
            jax.ShapeDtypeStruct((B, HW), x2.dtype),
            jax.ShapeDtypeStruct((B, C, HW), x2.dtype),
        ),
        compiler_params=pltpu.CompilerParams(
            dimension_semantics=("parallel", "parallel"),
            vmem_limit_bytes=int(vmem_limit)),
        cost_estimate=pl.CostEstimate(
            flops=int(B * HW * (2 * C * C + 12 * C + 32)),
            transcendentals=int(B * HW),
            bytes_accessed=int(B * HW * (2 * C + DIFF_CH + 1) * itemsize)),
    )(x2, diff2, s1, s2, w1c, gamma, beta, w2d, sc)


# ----------------------------------------------------------------------------
# Public wrapper
# ----------------------------------------------------------------------------
def frequency_dynamic_filter(x, diff, params, *, spatial_tile=None):
    """x: (B, 2*depth, H, W), diff: (B, 6, H, W) -> {'mask': (B,1,H,W), 'out': x.shape}."""
    B, C, H, W = x.shape
    assert diff.shape == (B, DIFF_CH, H, W), "layer2 expects mean+max+6 diff channels"
    HW = H * W
    x2 = x.reshape(B, C, HW)
    diff2 = diff.reshape(B, DIFF_CH, HW)
    w1c, gamma, beta, w2d, sc = _prep_params(params, C)

    cfg = _tpu_config()
    budget, vmem_limit, two_cores = cfg["budget"], cfg["vmem_limit"], cfg["two_cores"]

    HWp = pl.cdiv(HW, _LANE) * _LANE          # sizing only - nothing is padded
    bytes_per_batch = _ROWS_F32 * HWp * 4

    use_fused = spatial_tile is None and bytes_per_batch <= budget
    bt = None
    if use_fused:
        raw = max(1, budget // bytes_per_batch)
        if two_cores and B > 1:
            # Keep >=2 "parallel" grid steps so both v7x TensorCores get work.
            raw = min(raw, max(_SUBLANE, pl.cdiv(B, 2)))
        if raw >= B:
            bt = B
        elif raw >= _SUBLANE:
            bt = (raw // _SUBLANE) * _SUBLANE  # keeps the 2-D mask block aligned
        else:
            use_fused = False                  # huge per-batch footprint -> tile spatially

    if use_fused:
        mask2, out2 = _run_fused(x2, diff2, w1c, gamma, beta, w2d, sc,
                                 int(bt), vmem_limit)
    else:
        # Spatially tiled two-pass path (large H*W, or forced via spatial_tile).
        # TODO(synk): for B==1 on v7x the stats pass is still a serial spatial
        # sweep on one core; a core_map split of the spatial axis would help.
        bt = B if B <= _SUBLANE else _SUBLANE
        if spatial_tile is not None:
            st = max(_LANE, (int(spatial_tile) // _LANE) * _LANE)
        else:
            st = max(_LANE, (budget // (_ROWS_F32 * 4 * bt)) // _LANE * _LANE)
        st = min(st, HWp)
        mask2, out2 = _run_tiled(x2, diff2, w1c, gamma, beta, w2d, sc,
                                 int(bt), int(st), vmem_limit)

    # Free reshapes (contiguous) - no slicing, no extra HBM passes.
    return {"mask": mask2.reshape(B, 1, H, W), "out": out2.reshape(B, C, H, W)}


# ----------------------------------------------------------------------------
# Pure-JAX reference and self-test
# ----------------------------------------------------------------------------
def _reference(x, diff, params):
    """Pure-JAX mirror of the PyTorch forward (InstanceNorm2d affine, ReLU, bias)."""
    w1, b1 = params["w1"], params["b1"]
    gamma, beta = params["gamma"], params["beta"]
    w2, b2 = params["w2"], params["b2"]

    proj = jnp.einsum("oc,bchw->bohw", w1, x) + b1[None, :, None, None]
    mu = jnp.mean(proj, axis=(2, 3), keepdims=True)
    var = jnp.mean((proj - mu) ** 2, axis=(2, 3), keepdims=True)
    proj = (proj - mu) / jnp.sqrt(var + EPS)
    proj = proj * gamma[None, :, None, None] + beta[None, :, None, None]
    proj = jnp.maximum(proj, 0.0)

    pre_mask = jnp.concatenate(
        [jnp.mean(proj, axis=1, keepdims=True),
         jnp.max(proj, axis=1, keepdims=True),
         diff], axis=1)                                          # (B, 8, H, W)
    mask = jax.nn.sigmoid(
        jnp.einsum("c,bchw->bhw", w2, pre_mask)[:, None] + b2[0])
    return {"mask": mask, "out": mask * x}


if __name__ == "__main__":
    depth = 4
    C = depth * 2                     # 8 channels into layer1
    key = jax.random.PRNGKey(0)
    kp, k1, k2, k3 = jax.random.split(key, 4)
    pkeys = jax.random.split(kp, 6)

    params = {
        "w1": 0.3 * jax.random.normal(pkeys[0], (C, C), dtype=jnp.float32),
        "b1": 0.1 * jax.random.normal(pkeys[1], (C,), dtype=jnp.float32),
        "gamma": 1.0 + 0.1 * jax.random.normal(pkeys[2], (C,), dtype=jnp.float32),
        "beta": 0.1 * jax.random.normal(pkeys[3], (C,), dtype=jnp.float32),
        "w2": 0.5 * jax.random.normal(pkeys[4], (2 + DIFF_CH,), dtype=jnp.float32),
        "b2": 0.1 * jax.random.normal(pkeys[5], (1,), dtype=jnp.float32),
    }

    def make_inputs(k, B, H, W):
        kx, kd = jax.random.split(k)
        x = jax.random.normal(kx, (B, C, H, W), dtype=jnp.float32)
        d = jax.random.normal(kd, (B, DIFF_CH, H, W), dtype=jnp.float32)
        return x, d

    def check(x, d, **kw):
        out = frequency_dynamic_filter(x, d, params, **kw)
        jax.block_until_ready(out)
        ref = _reference(x, d, params)
        np.testing.assert_allclose(np.asarray(out["mask"]), np.asarray(ref["mask"]),
                                   rtol=1e-5, atol=1e-5)
        np.testing.assert_allclose(np.asarray(out["out"]), np.asarray(ref["out"]),
                                   rtol=1e-5, atol=1e-5)

    # 1) fused single-pass path, lane-aligned H*W
    check(*make_inputs(k1, 2, 16, 16))
    # 2) fused path with a ragged H*W (not a multiple of 128; no wrapper padding)
    check(*make_inputs(k2, 2, 10, 13))
    # 3) spatially tiled two-pass path, including a partial last spatial tile
    check(*make_inputs(k3, 3, 20, 13), spatial_tile=128)

    print("KERNEL_OK")
</pallas_src>

<mosaic_0001>
module attributes {stable_mosaic.version = 11 : i64} {
  func.func @_fdf_fused_kernel(%arg0: i32, %arg1: memref<2x8x256xf32, #tpu.memory_space<vmem>>, %arg2: memref<2x6x256xf32, #tpu.memory_space<vmem>>, %arg3: memref<8x8x1xf32, #tpu.memory_space<vmem>>, %arg4: memref<1x8xf32, #tpu.memory_space<vmem>>, %arg5: memref<1x8xf32, #tpu.memory_space<vmem>>, %arg6: memref<6x1xf32, #tpu.memory_space<vmem>>, %arg7: memref<3xf32, #tpu.memory_space<smem>>, %arg8: memref<2x256xf32, #tpu.memory_space<vmem>>, %arg9: memref<2x8x256xf32, #tpu.memory_space<vmem>>) attributes {dimension_semantics = [#tpu.dimension_semantics<parallel>], iteration_bounds = array<i64: 1>, scalar_prefetch = 0 : i64, scratch_operands = 0 : i64, tpu.core_type = #tpu.core_type<tc>, window_params = [{transform_indices = @transform_0, window_bounds = array<i64: 2, 8, 256>}, {transform_indices = @transform_1, window_bounds = array<i64: 2, 6, 256>}, {pipeline_mode = #tpu.pipeline_mode<synchronous>, transform_indices = @transform_2, window_bounds = array<i64: 8, 8, 1>}, {pipeline_mode = #tpu.pipeline_mode<synchronous>, transform_indices = @transform_3, window_bounds = array<i64: 1, 8>}, {pipeline_mode = #tpu.pipeline_mode<synchronous>, transform_indices = @transform_4, window_bounds = array<i64: 1, 8>}, {pipeline_mode = #tpu.pipeline_mode<synchronous>, transform_indices = @transform_5, window_bounds = array<i64: 6, 1>}, {transform_indices = @transform_6, window_bounds = array<i64: 3>}, {transform_indices = @transform_7, window_bounds = array<i64: 2, 256>}, {transform_indices = @transform_8, window_bounds = array<i64: 2, 8, 256>}]} {
    %c0 = arith.constant 0 : index
    %c0_0 = arith.constant 0 : index
    %c0_1 = arith.constant 0 : index
    %0 = vector.load %arg3[%c0, %c0_0, %c0_1] : memref<8x8x1xf32, #tpu.memory_space<vmem>>, vector<8x8x1xf32>
    %c0_2 = arith.constant 0 : index
    %c0_3 = arith.constant 0 : index
    %c0_4 = arith.constant 0 : index
    %1 = vector.load %arg1[%c0_2, %c0_3, %c0_4] : memref<2x8x256xf32, #tpu.memory_space<vmem>>, vector<2x1x256xf32>
    %2 = vector.extract_strided_slice %0 {offsets = [0, 0, 0], sizes = [1, 8, 1], strides = [1, 1, 1]} : vector<8x8x1xf32> to vector<1x8x1xf32>
    %3 = vector.shape_cast %2 : vector<1x8x1xf32> to vector<8x1xf32>
    %4 = vector.shape_cast %3 : vector<8x1xf32> to vector<1x8x1xf32>
    %5 = vector.broadcast %1 : vector<2x1x256xf32> to vector<2x8x256xf32>
    %6 = vector.broadcast %4 : vector<1x8x1xf32> to vector<2x8x256xf32>
    %7 = arith.mulf %5, %6 : vector<2x8x256xf32>
    %c0_5 = arith.constant 0 : index
    %c1 = arith.constant 1 : index
    %c0_6 = arith.constant 0 : index
    %8 = vector.load %arg1[%c0_5, %c1, %c0_6] : memref<2x8x256xf32, #tpu.memory_space<vmem>>, vector<2x1x256xf32>
    %9 = vector.extract_strided_slice %0 {offsets = [1, 0, 0], sizes = [1, 8, 1], strides = [1, 1, 1]} : vector<8x8x1xf32> to vector<1x8x1xf32>
    %10 = vector.shape_cast %9 : vector<1x8x1xf32> to vector<8x1xf32>
    %11 = vector.shape_cast %10 : vector<8x1xf32> to vector<1x8x1xf32>
    %12 = vector.broadcast %8 : vector<2x1x256xf32> to vector<2x8x256xf32>
    %13 = vector.broadcast %11 : vector<1x8x1xf32> to vector<2x8x256xf32>
    %14 = arith.mulf %12, %13 : vector<2x8x256xf32>
    %15 = arith.addf %7, %14 : vector<2x8x256xf32>
    %c0_7 = arith.constant 0 : index
    %c2 = arith.constant 2 : index
    %c0_8 = arith.constant 0 : index
    %16 = vector.load %arg1[%c0_7, %c2, %c0_8] : memref<2x8x256xf32, #tpu.memory_space<vmem>>, vector<2x1x256xf32>
    %17 = vector.extract_strided_slice %0 {offsets = [2, 0, 0], sizes = [1, 8, 1], strides = [1, 1, 1]} : vector<8x8x1xf32> to vector<1x8x1xf32>
    %18 = vector.shape_cast %17 : vector<1x8x1xf32> to vector<8x1xf32>
    %19 = vector.shape_cast %18 : vector<8x1xf32> to vector<1x8x1xf32>
    %20 = vector.broadcast %16 : vector<2x1x256xf32> to vector<2x8x256xf32>
    %21 = vector.broadcast %19 : vector<1x8x1xf32> to vector<2x8x256xf32>
    %22 = arith.mulf %20, %21 : vector<2x8x256xf32>
    %23 = arith.addf %15, %22 : vector<2x8x256xf32>
    %c0_9 = arith.constant 0 : index
    %c3 = arith.constant 3 : index
    %c0_10 = arith.constant 0 : index
    %24 = vector.load %arg1[%c0_9, %c3, %c0_10] : memref<2x8x256xf32, #tpu.memory_space<vmem>>, vector<2x1x256xf32>
    %25 = vector.extract_strided_slice %0 {offsets = [3, 0, 0], sizes = [1, 8, 1], strides = [1, 1, 1]} : vector<8x8x1xf32> to vector<1x8x1xf32>
    %26 = vector.shape_cast %25 : vector<1x8x1xf32> to vector<8x1xf32>
    %27 = vector.shape_cast %26 : vector<8x1xf32> to vector<1x8x1xf32>
    %28 = vector.broadcast %24 : vector<2x1x256xf32> to vector<2x8x256xf32>
    %29 = vector.broadcast %27 : vector<1x8x1xf32> to vector<2x8x256xf32>
    %30 = arith.mulf %28, %29 : vector<2x8x256xf32>
    %31 = arith.addf %23, %30 : vector<2x8x256xf32>
    %c0_11 = arith.constant 0 : index
    %c4 = arith.constant 4 : index
    %c0_12 = arith.constant 0 : index
    %32 = vector.load %arg1[%c0_11, %c4, %c0_12] : memref<2x8x256xf32, #tpu.memory_space<vmem>>, vector<2x1x256xf32>
    %33 = vector.extract_strided_slice %0 {offsets = [4, 0, 0], sizes = [1, 8, 1], strides = [1, 1, 1]} : vector<8x8x1xf32> to vector<1x8x1xf32>
    %34 = vector.shape_cast %33 : vector<1x8x1xf32> to vector<8x1xf32>
    %35 = vector.shape_cast %34 : vector<8x1xf32> to vector<1x8x1xf32>
    %36 = vector.broadcast %32 : vector<2x1x256xf32> to vector<2x8x256xf32>
    %37 = vector.broadcast %35 : vector<1x8x1xf32> to vector<2x8x256xf32>
    %38 = arith.mulf %36, %37 : vector<2x8x256xf32>
    %39 = arith.addf %31, %38 : vector<2x8x256xf32>
    %c0_13 = arith.constant 0 : index
    %c5 = arith.constant 5 : index
    %c0_14 = arith.constant 0 : index
    %40 = vector.load %arg1[%c0_13, %c5, %c0_14] : memref<2x8x256xf32, #tpu.memory_space<vmem>>, vector<2x1x256xf32>
    %41 = vector.extract_strided_slice %0 {offsets = [5, 0, 0], sizes = [1, 8, 1], strides = [1, 1, 1]} : vector<8x8x1xf32> to vector<1x8x1xf32>
    %42 = vector.shape_cast %41 : vector<1x8x1xf32> to vector<8x1xf32>
    %43 = vector.shape_cast %42 : vector<8x1xf32> to vector<1x8x1xf32>
    %44 = vector.broadcast %40 : vector<2x1x256xf32> to vector<2x8x256xf32>
    %45 = vector.broadcast %43 : vector<1x8x1xf32> to vector<2x8x256xf32>
    %46 = arith.mulf %44, %45 : vector<2x8x256xf32>
    %47 = arith.addf %39, %46 : vector<2x8x256xf32>
    %c0_15 = arith.constant 0 : index
    %c6 = arith.constant 6 : index
    %c0_16 = arith.constant 0 : index
    %48 = vector.load %arg1[%c0_15, %c6, %c0_16] : memref<2x8x256xf32, #tpu.memory_space<vmem>>, vector<2x1x256xf32>
    %49 = vector.extract_strided_slice %0 {offsets = [6, 0, 0], sizes = [1, 8, 1], strides = [1, 1, 1]} : vector<8x8x1xf32> to vector<1x8x1xf32>
    %50 = vector.shape_cast %49 : vector<1x8x1xf32> to vector<8x1xf32>
    %51 = vector.shape_cast %50 : vector<8x1xf32> to vector<1x8x1xf32>
    %52 = vector.broadcast %48 : vector<2x1x256xf32> to vector<2x8x256xf32>
    %53 = vector.broadcast %51 : vector<1x8x1xf32> to vector<2x8x256xf32>
    %54 = arith.mulf %52, %53 : vector<2x8x256xf32>
    %55 = arith.addf %47, %54 : vector<2x8x256xf32>
    %c0_17 = arith.constant 0 : index
    %c7 = arith.constant 7 : index
    %c0_18 = arith.constant 0 : index
    %56 = vector.load %arg1[%c0_17, %c7, %c0_18] : memref<2x8x256xf32, #tpu.memory_space<vmem>>, vector<2x1x256xf32>
    %57 = vector.extract_strided_slice %0 {offsets = [7, 0, 0], sizes = [1, 8, 1], strides = [1, 1, 1]} : vector<8x8x1xf32> to vector<1x8x1xf32>
    %58 = vector.shape_cast %57 : vector<1x8x1xf32> to vector<8x1xf32>
    %59 = vector.shape_cast %58 : vector<8x1xf32> to vector<1x8x1xf32>
    %60 = vector.broadcast %56 : vector<2x1x256xf32> to vector<2x8x256xf32>
    %61 = vector.broadcast %59 : vector<1x8x1xf32> to vector<2x8x256xf32>
    %62 = arith.mulf %60, %61 : vector<2x8x256xf32>
    %63 = arith.addf %55, %62 : vector<2x8x256xf32>
    %cst = arith.constant dense<0.000000e+00> : vector<2x8xf32>
    %64 = vector.multi_reduction <add>, %63, %cst [2] : vector<2x8x256xf32> to vector<2x8xf32>
    %65 = vector.shape_cast %64 : vector<2x8xf32> to vector<2x8x1xf32>
    %cst_19 = arith.constant 3.906250e-03 : f32
    %66 = vector.broadcast %cst_19 : f32 to vector<2x8x1xf32>
    %67 = arith.mulf %65, %66 : vector<2x8x1xf32>
    %68 = vector.broadcast %67 : vector<2x8x1xf32> to vector<2x8x256xf32>
    %69 = arith.subf %63, %68 : vector<2x8x256xf32>
    %70 = arith.mulf %69, %69 : vector<2x8x256xf32>
    %cst_20 = arith.constant dense<0.000000e+00> : vector<2x8xf32>
    %71 = vector.multi_reduction <add>, %70, %cst_20 [2] : vector<2x8x256xf32> to vector<2x8xf32>
    %72 = vector.shape_cast %71 : vector<2x8xf32> to vector<2x8x1xf32>
    %cst_21 = arith.constant 3.906250e-03 : f32
    %73 = vector.broadcast %cst_21 : f32 to vector<2x8x1xf32>
    %74 = arith.mulf %72, %73 : vector<2x8x1xf32>
    %c0_22 = arith.constant 0 : index
    %c0_23 = arith.constant 0 : index
    %75 = vector.load %arg4[%c0_22, %c0_23] : memref<1x8xf32, #tpu.memory_space<vmem>>, vector<1x8xf32>
    %76 = vector.shape_cast %75 : vector<1x8xf32> to vector<1x8x1xf32>
    %cst_24 = arith.constant 9.99999974E-6 : f32
    %77 = vector.broadcast %cst_24 : f32 to vector<2x8x1xf32>
    %78 = arith.addf %74, %77 : vector<2x8x1xf32>
    %79 = math.rsqrt %78 : vector<2x8x1xf32>
    %80 = vector.broadcast %76 : vector<1x8x1xf32> to vector<2x8x1xf32>
    %81 = arith.mulf %80, %79 : vector<2x8x1xf32>
    %82 = vector.broadcast %81 : vector<2x8x1xf32> to vector<2x8x256xf32>
    %83 = arith.mulf %69, %82 : vector<2x8x256xf32>
    %c0_25 = arith.constant 0 : index
    %c0_26 = arith.constant 0 : index
    %84 = vector.load %arg5[%c0_25, %c0_26] : memref<1x8xf32, #tpu.memory_space<vmem>>, vector<1x8xf32>
    %85 = vector.shape_cast %84 : vector<1x8xf32> to vector<1x8x1xf32>
    %86 = vector.broadcast %85 : vector<1x8x1xf32> to vector<2x8x256xf32>
    %87 = arith.addf %83, %86 : vector<2x8x256xf32>
    %cst_27 = arith.constant 0.000000e+00 : f32
    %88 = vector.broadcast %cst_27 : f32 to vector<2x8x256xf32>
    %89 = arith.maximumf %87, %88 : vector<2x8x256xf32>
    %cst_28 = arith.constant dense<0.000000e+00> : vector<2x256xf32>
    %90 = vector.multi_reduction <add>, %89, %cst_28 [1] : vector<2x8x256xf32> to vector<2x256xf32>
    %cst_29 = arith.constant 8.000000e+00 : f32
    %91 = vector.broadcast %cst_29 : f32 to vector<2x256xf32>
    %92 = arith.divf %90, %91 : vector<2x256xf32>
    %cst_30 = arith.constant dense<0xFF800000> : vector<2x256xf32>
    %93 = vector.multi_reduction <maximumf>, %89, %cst_30 [1] : vector<2x8x256xf32> to vector<2x256xf32>
    %c0_31 = arith.constant 0 : index
    %c0_32 = arith.constant 0 : index
    %c0_33 = arith.constant 0 : index
    %94 = vector.load %arg2[%c0_31, %c0_32, %c0_33] : memref<2x6x256xf32, #tpu.memory_space<vmem>>, vector<2x6x256xf32>
    %c0_34 = arith.constant 0 : index
    %c0_35 = arith.constant 0 : index
    %95 = vector.load %arg6[%c0_34, %c0_35] : memref<6x1xf32, #tpu.memory_space<vmem>>, vector<6x1xf32>
    %96 = vector.shape_cast %95 : vector<6x1xf32> to vector<1x6x1xf32>
    %97 = vector.broadcast %96 : vector<1x6x1xf32> to vector<2x6x256xf32>
    %98 = arith.mulf %94, %97 : vector<2x6x256xf32>
    %cst_36 = arith.constant dense<0.000000e+00> : vector<2x256xf32>
    %99 = vector.multi_reduction <add>, %98, %cst_36 [1] : vector<2x6x256xf32> to vector<2x256xf32>
    %c0_37 = arith.constant 0 : index
    %100 = memref.load %arg7[%c0_37] : memref<3xf32, #tpu.memory_space<smem>>
    %101 = vector.broadcast %100 : f32 to vector<2x256xf32>
    %102 = arith.mulf %101, %92 : vector<2x256xf32>
    %c1_38 = arith.constant 1 : index
    %103 = memref.load %arg7[%c1_38] : memref<3xf32, #tpu.memory_space<smem>>
    %104 = vector.broadcast %103 : f32 to vector<2x256xf32>
    %105 = arith.mulf %104, %93 : vector<2x256xf32>
    %106 = arith.addf %102, %105 : vector<2x256xf32>
    %107 = arith.addf %106, %99 : vector<2x256xf32>
    %c2_39 = arith.constant 2 : index
    %108 = memref.load %arg7[%c2_39] : memref<3xf32, #tpu.memory_space<smem>>
    %109 = vector.broadcast %108 : f32 to vector<2x256xf32>
    %110 = arith.addf %107, %109 : vector<2x256xf32>
    %cst_40 = arith.constant 0.000000e+00 : f32
    %111 = vector.broadcast %cst_40 : f32 to vector<2x256xf32>
    %112 = arith.subf %111, %110 : vector<2x256xf32>
    %113 = math.exp %112 : vector<2x256xf32>
    %cst_41 = arith.constant 1.000000e+00 : f32
    %114 = vector.broadcast %cst_41 : f32 to vector<2x256xf32>
    %115 = arith.addf %114, %113 : vector<2x256xf32>
    %cst_42 = arith.constant 1.000000e+00 : f32
    %116 = vector.broadcast %cst_42 : f32 to vector<2x256xf32>
    %117 = arith.divf %116, %115 : vector<2x256xf32>
    %c0_43 = arith.constant 0 : index
    %c0_44 = arith.constant 0 : index
    %118 = vector.load %arg8[%c0_43, %c0_44] : memref<2x256xf32, #tpu.memory_space<vmem>>, vector<2x256xf32>
    tpu.vector_store %arg8[%c0_43, %c0_44], %117 {strides = array<i32>} : memref<2x256xf32, #tpu.memory_space<vmem>>, vector<2x256xf32>,
    %119 = vector.shape_cast %117 : vector<2x256xf32> to vector<2x1x256xf32>
    %c0_45 = arith.constant 0 : index
    %c0_46 = arith.constant 0 : index
    %c0_47 = arith.constant 0 : index
    %120 = vector.load %arg1[%c0_45, %c0_46, %c0_47] : memref<2x8x256xf32, #tpu.memory_space<vmem>>, vector<2x8x256xf32>
    %121 = vector.broadcast %119 : vector<2x1x256xf32> to vector<2x8x256xf32>
    %122 = arith.mulf %121, %120 : vector<2x8x256xf32>
    %c0_48 = arith.constant 0 : index
    %c0_49 = arith.constant 0 : index
    %c0_50 = arith.constant 0 : index
    %123 = vector.load %arg9[%c0_48, %c0_49, %c0_50] : memref<2x8x256xf32, #tpu.memory_space<vmem>>, vector<2x8x256xf32>
    tpu.vector_store %arg9[%c0_48, %c0_49, %c0_50], %122 {strides = array<i32>} : memref<2x8x256xf32, #tpu.memory_space<vmem>>, vector<2x8x256xf32>,
    return
  }
  func.func @transform_0(%arg0: i32) -> (i32, i32, i32) {
    %c0_i32 = arith.constant 0 : i32
    %c0_i32_0 = arith.constant 0 : i32
    %c0_i32_1 = arith.constant 0 : i32
    return %arg0, %c0_i32, %c0_i32_0 : i32, i32, i32
  }
  func.func @transform_1(%arg0: i32) -> (i32, i32, i32) {
    %c0_i32 = arith.constant 0 : i32
    %c0_i32_0 = arith.constant 0 : i32
    %c0_i32_1 = arith.constant 0 : i32
    return %arg0, %c0_i32, %c0_i32_0 : i32, i32, i32
  }
  func.func @transform_2(%arg0: i32) -> (i32, i32, i32) {
    %c0_i32 = arith.constant 0 : i32
    %c0_i32_0 = arith.constant 0 : i32
    %c0_i32_1 = arith.constant 0 : i32
    %c0_i32_2 = arith.constant 0 : i32
    return %c0_i32, %c0_i32_0, %c0_i32_1 : i32, i32, i32
  }
  func.func @transform_3(%arg0: i32) -> (i32, i32) {
    %c0_i32 = arith.constant 0 : i32
    %c0_i32_0 = arith.constant 0 : i32
    %c0_i32_1 = arith.constant 0 : i32
    return %c0_i32, %c0_i32_0 : i32, i32
  }
  func.func @transform_4(%arg0: i32) -> (i32, i32) {
    %c0_i32 = arith.constant 0 : i32
    %c0_i32_0 = arith.constant 0 : i32
    %c0_i32_1 = arith.constant 0 : i32
    return %c0_i32, %c0_i32_0 : i32, i32
  }
  func.func @transform_5(%arg0: i32) -> (i32, i32) {
    %c0_i32 = arith.constant 0 : i32
    %c0_i32_0 = arith.constant 0 : i32
    %c0_i32_1 = arith.constant 0 : i32
    return %c0_i32, %c0_i32_0 : i32, i32
  }
  func.func @transform_6(%arg0: i32) -> i32 {
    %c0_i32 = arith.constant 0 : i32
    %c0_i32_0 = arith.constant 0 : i32
    return %c0_i32 : i32
  }
  func.func @transform_7(%arg0: i32) -> (i32, i32) {
    %c0_i32 = arith.constant 0 : i32
    %c0_i32_0 = arith.constant 0 : i32
    return %arg0, %c0_i32 : i32, i32
  }
  func.func @transform_8(%arg0: i32) -> (i32, i32, i32) {
    %c0_i32 = arith.constant 0 : i32
    %c0_i32_0 = arith.constant 0 : i32
    %c0_i32_1 = arith.constant 0 : i32
    return %arg0, %c0_i32, %c0_i32_0 : i32, i32, i32
  }
}

</mosaic_0001>

<bundles_post_ra>
// kernel: tpu_custom_call.1
= control target key start
LH: loop header
LB: loop body
LE: loop exit
PB: predicated region body
PF: predicated region fallthrough
CT: control target
= control target key end

     0   :  { %14 = vsyncpa [#allocation4], 0  ;;  %s1013_s0 = inlined_call_operand.vmem [shape: f32[2,8,256], index: 0, kind: input, shape index: {}]   ;;  %s1014_s1 = inlined_call_operand.vmem [shape: f32[2,6,256], index: 1, kind: input, shape index: {}]   ;;  %s1015_s2 = inlined_call_operand.vmem [shape: f32[8,8,1], index: 2, kind: input, shape index: {}]   ;;  %s1016_s3 = inlined_call_operand.vmem [shape: f32[1,8], index: 3, kind: input, shape index: {}]   ;;  %s1017_s4 = inlined_call_operand.vmem [shape: f32[1,8], index: 4, kind: input, shape index: {}]   ;;  %s1018_s5 = inlined_call_operand.vmem [shape: f32[6,1], index: 5, kind: input, shape index: {}]   ;;  %s1019_s6 = inlined_call_operand.vmem [shape: f32[3], index: 6, kind: input, shape index: {}]   ;;  %s1020_s7 = inlined_call_operand.hbm [shape: f32[2,256], index: 7, kind: output, shape index: {0}]   ;;  %s1021_s8 = inlined_call_operand.hbm [shape: f32[2,8,256], index: 8, kind: output, shape index: {1}]  }
   0x1   :  { %15 = vsyncpa [#allocation3], 0 }
   0x2   :  { %16 = vsyncpa [#allocation7], 0  ;;  %s35_s29 = sshll.u32 %s1019_s6, 4  ;;  %s36_s29 = int_to_ptr.vmem [resolvable:$true] %s35_s29 }
   0x3   :  { %s688_s30 = scalar_lea.vmem %s36_s29, 16  ;;  %p693_p1 = scmp.lt.s32.totalorder %s36_s29, %s36_s29 }
   0x4   :  { %p689_p0 = scmp.ne.s32.totalorder %s36_s29, %s688_s30  ;;  %p694_p2 = scmp.lt.s32.totalorder %s688_s30, %s688_s30 }
   0x6   :  { %p695_p3 = por %p694_p2, %p693_p1 }
   0x8   :  { %p696_p4 = pnand %p695_p3, %p689_p0 }
   0xa   :  { %699 = shalt.err (!%p696_p4)
}
   0xb   :  { %s746_s9 = smov [#allocation2]  }
   0xc   :  { %38 = dma.vmem_to_smem %s36_s29, 16, %s746_s9, [#allocation4]  }
   0xd   :  { %740 = dma.done.wait [#allocation4], 16  }
   0xe   :  { %741 = vsyncadd [#allocation4], 4294967280 }
   0xf   :  { %42 = sfence }
  0x10   :  { %v45_v0 = vld [vmem:[%s1015_s2 + $0x10] sm:$0xff]  ;;  %v43_v1 = vld [vmem:[%s1015_s2] sm:$0xff]  ;;  %v747_v2 = vmov 0   ;;  %v46_v3 = vld [vmem:[%s1015_s2 + $0x18] sm:$0xff]  ;;  %v56_v9 = vlaneseq  ;;  %vm483_vm0 = vcmask 1045504   ;;  %s657_s20 = sld [smem:[#allocation2 + $0x1]] }
  0x11   :  { %667 = vset.pattern.permute.xlu1 %v747_v2  ;;  %666 = vset.pattern.permute.xlu0 %v747_v2  ;;  %v44_v4 = vld [vmem:[%s1015_s2 + $0x8] sm:$0xff]  ;;  %v47_v6 = vld [vmem:[%s1015_s2 + $0x20] sm:$0xff]  ;;  %v50_v7 = vld [vmem:[%s1015_s2 + $0x38] sm:$0xff]  ;;  %s983_s21 = sld [smem:[#allocation2 + $0x2]]  ;;  %s749_s28 = smov [#allocation6]   ;;  %vm587_vm1 = vcmask 1041409  }
  0x12   :  { %152 = vperm.xlu1 %667, %v45_v0   ;;  %78 = vperm.xlu0 %666, %v43_v1   ;;  %v48_v5 = vld [vmem:[%s1015_s2 + $0x28] sm:$0xff]  ;;  %v49_v8 = vld [vmem:[%s1015_s2 + $0x30] sm:$0xff]  ;;  %v825_v10 = vshrl.u32 %v56_v9, 7  ;;  %s624_s2 = sshll.u32 %s749_s28, 4  ;;  %vm589_vm2 = vcmask 1043459   ;;  %s750_s9 = smov [#allocation5]   ;;  %s625_s2 = int_to_ptr.vmem [resolvable:$true] %s624_s2 }
  0x13   :  { %v830_v11 = vld [vmem:[%s1013_s0 + $0x2] ss:$8 sm:$0x3]  ;;  %v841_v14 = vld [vmem:[%s1013_s0 + $0x12] ss:$8 sm:$0x3]  ;;  %p705_p6 = scmp.lt.s32.totalorder %s625_s2, %s625_s2 }
  0x14   :  { %v833_v12 = vsub.s32 0, %v825_v10  ;;  %v836_v13 = vsub.s32 1, %v825_v10  ;;  %v51_v15 = vld [vmem:[%s1013_s0] ss:$8 sm:$0x3]  ;;  %s615_s10 = sshll.u32 %s750_s9, 4  ;;  %s616_s10 = int_to_ptr.vmem [resolvable:$true] %s615_s10 }
  0x15   :  { %v640_v16 = vld [vmem:[%s1013_s0 + $0x10] ss:$8 sm:$0x3]  ;;  %v852_v17 = vld [vmem:[%s1013_s0 + $0x3] ss:$8 sm:$0x3] }
  0x16   :  { %191 = vperm.xlu1 %667, %v46_v3   ;;  %113 = vperm.xlu0 %666, %v44_v4   ;;  %v857_v18 = vld [vmem:[%s1013_s0 + $0x13] ss:$8 sm:$0x3]  ;;  %v133_v19 = vrot.slane %v830_v11, %v833_v12  ;;  %v137_v20 = vrot.slane %v830_v11, %v836_v13  ;;  %v141_v21 = vrot.slane %v841_v14, %v833_v12  ;;  %v641_v23 = vld [vmem:[%s1013_s0 + $0x1] ss:$8 sm:$0x3] }
  0x17   :  { %v145_v22 = vrot.slane %v841_v14, %v836_v13  ;;  %v642_v24 = vld [vmem:[%s1013_s0 + $0x11] ss:$8 sm:$0x3]  ;;  %v59_v25 = vrot.slane %v51_v15, %v833_v12  ;;  %v63_v26 = vrot.slane %v51_v15, %v836_v13  ;;  %v67_v27 = vrot.slane %v640_v16, %v833_v12  ;;  %v880_v29 = vld [vmem:[%s1013_s0 + $0x5] ss:$8 sm:$0x3] }
  0x18   :  { %v71_v28 = vrot.slane %v640_v16, %v836_v13  ;;  %v885_v30 = vld [vmem:[%s1013_s0 + $0x15] ss:$8 sm:$0x3]  ;;  %v172_v31 = vrot.slane %v852_v17, %v833_v12  ;;  %v176_v32 = vrot.slane %v852_v17, %v836_v13  ;;  %v180_v33 = vrot.slane %v857_v18, %v833_v12  ;;  %v647_v35 = vld [vmem:[%s1013_s0 + $0x4] ss:$8 sm:$0x3] }
  0x19   :  { %v184_v34 = vrot.slane %v857_v18, %v836_v13  ;;  %v648_v36 = vld [vmem:[%s1013_s0 + $0x14] ss:$8 sm:$0x3]  ;;  %v94_v39 = vrot.slane %v641_v23, %v833_v12  ;;  %v98_v40 = vrot.slane %v641_v23, %v836_v13  ;;  %v102_v41 = vrot.slane %v642_v24, %v833_v12  ;;  %v908_v43 = vld [vmem:[%s1013_s0 + $0x6] ss:$8 sm:$0x3] }
  0x1a   :  { %269 = vperm.xlu1 %667, %v48_v5   ;;  %230 = vperm.xlu0 %666, %v47_v6   ;;  %v106_v42 = vrot.slane %v642_v24, %v836_v13  ;;  %v913_v44 = vld [vmem:[%s1013_s0 + $0x16] ss:$8 sm:$0x3]  ;;  %v250_v45 = vrot.slane %v880_v29, %v833_v12  ;;  %v254_v46 = vrot.slane %v880_v29, %v836_v13  ;;  %v926_v49 = vld [vmem:[%s1013_s0 + $0x17] ss:$8 sm:$0x3] }
  0x1b   :  { %v258_v47 = vrot.slane %v885_v30, %v833_v12  ;;  %v262_v48 = vrot.slane %v885_v30, %v836_v13  ;;  %v931_v50 = vld [vmem:[%s1013_s0 + $0x7] ss:$8 sm:$0x3]  ;;  %v211_v51 = vrot.slane %v647_v35, %v833_v12  ;;  %v215_v52 = vrot.slane %v647_v35, %v836_v13  ;;  %s700_s11 = scalar_lea.vmem %s625_s2, 512 }
  0x1c   :  { %v219_v53 = vrot.slane %v648_v36, %v833_v12  ;;  %v223_v54 = vrot.slane %v648_v36, %v836_v13  ;;  %v289_v55 = vrot.slane %v908_v43, %v833_v12  ;;  %v293_v56 = vrot.slane %v908_v43, %v836_v13  ;;  %p701_p5 = scmp.ne.s32.totalorder %s625_s2, %s700_s11  ;;  %p706_p7 = scmp.lt.s32.totalorder %s700_s11, %s700_s11 }
  0x1d   :  { %v297_v57 = vrot.slane %v913_v44, %v833_v12  ;;  %v301_v58 = vrot.slane %v913_v44, %v836_v13  ;;  %v336_v61 = vrot.slane %v926_v49, %v833_v12  ;;  %v340_v62 = vrot.slane %v926_v49, %v836_v13 }
  0x1e   :  { %347 = vperm.xlu1 %667, %v50_v7   ;;  %308 = vperm.xlu0 %666, %v49_v8   ;;  %v328_v63 = vrot.slane %v931_v50, %v833_v12  ;;  %v332_v0 = vrot.slane %v931_v50, %v836_v13  ;;  %vm591_vm3 = vcmask 1045509   ;;  %p707_p8 = por %p706_p7, %p705_p6 }
  0x20   :  { %p708_p9 = pnand %p707_p8, %p701_p5 }
  0x8d   :  { %v153_v37 = vpop.permute.xlu1 %152  ;;  %v79_v38 = vpop.permute.xlu0 %78 }
  0x8e   :  { %v81_v1 = vmul.f32 %v79_v38, %v59_v25  ;;  %v82_v2 = vmul.f32 %v79_v38, %v63_v26  ;;  %v83_v3 = vmul.f32 %v79_v38, %v67_v27  ;;  %v84_v4 = vmul.f32 %v79_v38, %v71_v28 }
  0x8f   :  { %v155_v9 = vmul.f32 %v153_v37, %v133_v19  ;;  %v156_v11 = vmul.f32 %v153_v37, %v137_v20  ;;  %v157_v14 = vmul.f32 %v153_v37, %v141_v21  ;;  %v158_v15 = vmul.f32 %v153_v37, %v145_v22 }
  0x91   :  { %v192_v59 = vpop.permute.xlu1 %191  ;;  %v114_v60 = vpop.permute.xlu0 %113 }
  0x92   :  { %v116_v5 = vmul.f32 %v114_v60, %v94_v39  ;;  %v117_v6 = vmul.f32 %v114_v60, %v98_v40  ;;  %v118_v7 = vmul.f32 %v114_v60, %v102_v41  ;;  %v119_v8 = vmul.f32 %v114_v60, %v106_v42 }
  0x93   :  { %v194_v29 = vmul.f32 %v192_v59, %v172_v31  ;;  %v195_v13 = vmul.f32 %v192_v59, %v176_v32  ;;  %v196_v25 = vmul.f32 %v192_v59, %v180_v33  ;;  %v197_v26 = vmul.f32 %v192_v59, %v184_v34 }
  0x94   :  { %v120_v16 = vadd.f32 %v116_v5, %v81_v1  ;;  %v121_v17 = vadd.f32 %v117_v6, %v82_v2  ;;  %v122_v18 = vadd.f32 %v118_v7, %v83_v3  ;;  %v123_v23 = vadd.f32 %v119_v8, %v84_v4 }
  0x95   :  { %v270_v12 = vpop.permute.xlu1 %269  ;;  %v231_v24 = vpop.permute.xlu0 %230 }
  0x96   :  { %v159_v27 = vadd.f32 %v155_v9, %v120_v16  ;;  %v160_v28 = vadd.f32 %v156_v11, %v121_v17  ;;  %v161_v30 = vadd.f32 %v157_v14, %v122_v18  ;;  %v162_v35 = vadd.f32 %v158_v15, %v123_v23 }
  0x97   :  { %v233_v36 = vmul.f32 %v231_v24, %v211_v51  ;;  %v234_v38 = vmul.f32 %v231_v24, %v215_v52  ;;  %v235_v19 = vmul.f32 %v231_v24, %v219_v53  ;;  %v236_v20 = vmul.f32 %v231_v24, %v223_v54 }
  0x98   :  { %v198_v21 = vadd.f32 %v194_v29, %v159_v27  ;;  %v199_v22 = vadd.f32 %v195_v13, %v160_v28  ;;  %v200_v37 = vadd.f32 %v196_v25, %v161_v30  ;;  %v201_v39 = vadd.f32 %v197_v26, %v162_v35  ;;  %v656_v13 = vld [vmem:[%s1017_s4] ss:$0 sm:$0xff]  ;;  %v470_v30 = vld [vmem:[%s1014_s1 + $0x8] sm:$0x3f] }
  0x99   :  { %v309_v40 = vpop.permute.xlu0 %308  ;;  %v272_v41 = vmul.f32 %v270_v12, %v250_v45  ;;  %v273_v42 = vmul.f32 %v270_v12, %v254_v46  ;;  %v274_v43 = vmul.f32 %v270_v12, %v258_v47  ;;  %v275_v31 = vmul.f32 %v270_v12, %v262_v48  ;;  %v348_v49 = vpop.permute.xlu1 %347  ;;  %v469_v28 = vld [vmem:[%s1014_s1] sm:$0x3f] }
  0x9a   :  { %v237_v32 = vadd.f32 %v233_v36, %v198_v21  ;;  %v238_v33 = vadd.f32 %v234_v38, %v199_v22  ;;  %v239_v34 = vadd.f32 %v235_v19, %v200_v37  ;;  %v240_v44 = vadd.f32 %v236_v20, %v201_v39  ;;  %v471_v38 = vld [vmem:[%s1014_s1 + $0x10] sm:$0x3f]  ;;  %v472_v19 = vld [vmem:[%s1014_s1 + $0x18] sm:$0x3f]  ;;  %s974_s1 = sld [smem:[#allocation2]] }
  0x9b   :  { %v311_v50 = vmul.f32 %v309_v40, %v289_v55  ;;  %v312_v59 = vmul.f32 %v309_v40, %v293_v56  ;;  %v313_v51 = vmul.f32 %v309_v40, %v297_v57  ;;  %v314_v52 = vmul.f32 %v309_v40, %v301_v58  ;;  %v655_v57 = vld [vmem:[%s1016_s3] ss:$0 sm:$0xff] }
  0x9c   :  { %v278_v53 = vadd.f32 %v274_v43, %v239_v34  ;;  %v279_v54 = vadd.f32 %v275_v31, %v240_v44  ;;  %v276_v60 = vadd.f32 %v272_v41, %v237_v32  ;;  %v277_v1 = vadd.f32 %v273_v42, %v238_v33  ;;  %v473_v58 = vld [vmem:[%s1018_s5] sm:$0x3f] }
  0x9d   :  { %v352_v2 = vmul.f32 %v348_v49, %v336_v61  ;;  %v353_v3 = vmul.f32 %v348_v49, %v340_v62  ;;  %v350_v4 = vmul.f32 %v348_v49, %v328_v63  ;;  %v351_v45 = vmul.f32 %v348_v49, %v332_v0 }
  0x9e   :  { %v317_v46 = vadd.f32 %v313_v51, %v278_v53  ;;  %v318_v47 = vadd.f32 %v314_v52, %v279_v54  ;;  %v315_v48 = vadd.f32 %v311_v50, %v276_v60  ;;  %v316_v5 = vadd.f32 %v312_v59, %v277_v1 }
  0xa0   :  { %v356_v6 = vadd.f32 %v352_v2, %v317_v46  ;;  %v357_v7 = vadd.f32 %v353_v3, %v318_v47  ;;  %v354_v8 = vadd.f32 %v350_v4, %v315_v48  ;;  %v355_v9 = vadd.f32 %v351_v45, %v316_v5 }
  0xa2   :  { %v361_v55 = vadd.f32 %v357_v7, %v356_v6  ;;  %v358_v56 = vadd.f32 %v355_v9, %v354_v8 }
  0xa4   :  { %362 = vadd.xlane.f32.xlu0 %v361_v55  ;;  %359 = vadd.xlane.f32.xlu1 %v358_v56 }
  0xb5   :  { %388 = vbcast.lane.b32.xlu1 %v655_v57, 256 }
  0xb9   :  { %476 = vperm.xlu1 %667, %v473_v58  }
 0x12d   :  { %v363_v61 = vpop.xlane.xlu0 %362  ;;  %v360_v62 = vpop.xlane.xlu1 %359 }
 0x12e   :  { %v365_v63 = vmul.f32 0.00390625, %v363_v61  ;;  %v364_v0 = vmul.f32 0.00390625, %v360_v62 }
 0x130   :  { %v368_v11 = vsub.f32 %v356_v6, %v365_v63  ;;  %v369_v14 = vsub.f32 %v357_v7, %v365_v63  ;;  %v366_v15 = vsub.f32 %v354_v8, %v364_v0  ;;  %v367_v16 = vsub.f32 %v355_v9, %v364_v0 }
 0x131   :  { %v389_v25 = vpop.permute.xlu1 %388 }
 0x132   :  { %v372_v17 = vmul.f32 %v368_v11, %v368_v11  ;;  %v373_v18 = vmul.f32 %v369_v14, %v369_v14  ;;  %v370_v12 = vmul.f32 %v366_v15, %v366_v15  ;;  %v371_v24 = vmul.f32 %v367_v16, %v367_v16 }
 0x134   :  { %v377_v23 = vadd.f32 %v373_v18, %v372_v17  ;;  %v374_v29 = vadd.f32 %v371_v24, %v370_v12 }
 0x135   :  { %v477_v35 = vpop.permute.xlu1 %476 }
 0x136   :  { %378 = vadd.xlane.f32.xlu0 %v377_v23  ;;  %v479_v21 = vmul.f32 %v477_v35, %v469_v28  ;;  %v480_v22 = vmul.f32 %v477_v35, %v470_v30  ;;  %v481_v39 = vmul.f32 %v477_v35, %v471_v38  ;;  %v482_v40 = vmul.f32 %v477_v35, %v472_v19 }
 0x137   :  { %v513_v30 = vstv %s974_s1  ;;  %v519_v35 = vstv %s657_s20 }
 0x138   :  { %v484_v42 = vsel %vm483_vm0, %v479_v21, 0.0  ;;  %v491_v43 = vsel %vm483_vm0, %v480_v22, 0.0  ;;  %v498_v31 = vsel %vm483_vm0, %v481_v39, 0.0  ;;  %v505_v32 = vsel %vm483_vm0, %v482_v40, 0.0 }
 0x139   :  { %v485_v33 = vrot.slane %v484_v42, 4  ;;  %v492_v34 = vrot.slane %v491_v43, 4  ;;  %v499_v44 = vrot.slane %v498_v31, 4  ;;  %v506_v49 = vrot.slane %v505_v32, 4 }
 0x13a   :  { %375 = vadd.xlane.f32.xlu0 %v374_v29 }
 0x13b   :  { %v486_v50 = vadd.f32 %v485_v33, %v484_v42  ;;  %v493_v59 = vadd.f32 %v492_v34, %v491_v43  ;;  %v500_v52 = vadd.f32 %v499_v44, %v498_v31  ;;  %v507_v53 = vadd.f32 %v506_v49, %v505_v32 }
 0x13d   :  { %v487_v60 = vrot.slane %v486_v50, 2  ;;  %v494_v1 = vrot.slane %v493_v59, 2  ;;  %v501_v46 = vrot.slane %v500_v52, 2  ;;  %v508_v47 = vrot.slane %v507_v53, 2 }
 0x13f   :  { %v976_v7 = vadd.f32 %v487_v60, %v486_v50  ;;  %v978_v8 = vadd.f32 %v494_v1, %v493_v59  ;;  %v502_v58 = vadd.f32 %v501_v46, %v500_v52  ;;  %v509_v61 = vadd.f32 %v508_v47, %v507_v53 }
 0x141   :  { %v496_v17 = vrot.slane %v978_v8, 1  ;;  %v503_v29 = vrot.slane %v502_v58, 1 }
 0x150   :  { %406 = vbcast.lane.b32.xlu0 %v656_v13, 256 }
 0x1bf   :  { %v379_v26 = vpop.xlane.xlu0 %378 }
 0x1c0   :  { %v381_v27 = vmul.f32 0.00390625, %v379_v26 }
 0x1c2   :  { %v391_v36 = vadd.f32 1e-05, %v381_v27 }
 0x1c3   :  { %v376_v20 = vpop.xlane.xlu0 %375 }
 0x1c4   :  { %668 = vrsqrt.f32 %v391_v36  ;;  %v380_v37 = vmul.f32 0.00390625, %v376_v20 }
 0x1c6   :  { %v390_v41 = vadd.f32 1e-05, %v380_v37 }
 0x1c7   :  { %v407_v2 = vpop.permute.xlu0 %406 }
 0x1c8   :  { %670 = vrsqrt.f32 %v390_v41 }
 0x1d1   :  { %v669_v51 = vpop.eup %668 }
 0x1d2   :  { %v395_v54 = vmul.f32 %v669_v51, %v389_v25 }
 0x1d4   :  { %v398_v3 = vmul.f32 %v395_v54, %v368_v11  ;;  %v399_v4 = vmul.f32 %v395_v54, %v369_v14  ;;  %v489_v14 = vrot.slane %v976_v7, 1 }
 0x1d5   :  { %v671_v45 = vpop.eup %670 }
 0x1d6   :  { %v394_v48 = vmul.f32 %v671_v45, %v389_v25  ;;  %v410_v5 = vadd.f32 %v407_v2, %v398_v3  ;;  %v411_v6 = vadd.f32 %v407_v2, %v399_v4 }
 0x1d8   :  { %v396_v9 = vmul.f32 %v394_v48, %v366_v15  ;;  %v397_v55 = vmul.f32 %v394_v48, %v367_v16  ;;  %v414_v56 = vmax.f32 %v410_v5, 0.0  ;;  %v415_v57 = vmax.f32 %v411_v6, 0.0 }
 0x1d9   :  { %v510_v15 = vrot.slane %v509_v61, 1 }
 0x1da   :  { %v408_v62 = vadd.f32 %v407_v2, %v396_v9  ;;  %v409_v63 = vadd.f32 %v407_v2, %v397_v55  ;;  %v428_v0 = vrot.slane %v414_v56, 4  ;;  %v434_v11 = vrot.slane %v415_v57, 4 }
 0x1dc   :  { %v412_v18 = vmax.f32 %v408_v62, 0.0  ;;  %v413_v23 = vmax.f32 %v409_v63, 0.0  ;;  %v429_v12 = vadd.f32 %v428_v0, %v414_v56  ;;  %v435_v24 = vadd.f32 %v434_v11, %v415_v57 }
 0x1dd   :  { %v458_v16 = vmax.f32 %v414_v56, %v428_v0  ;;  %v464_v13 = vmax.f32 %v415_v57, %v434_v11  ;;  %v504_v57 = vadd.f32 %v503_v29, %v502_v58  ;;  %v511_v62 = vadd.f32 %v510_v15, %v509_v61 }
 0x1de   :  { %v416_v25 = vrot.slane %v412_v18, 4  ;;  %v422_v26 = vrot.slane %v413_v23, 4  ;;  %v430_v27 = vrot.slane %v429_v12, 2  ;;  %v436_v28 = vrot.slane %v435_v24, 2 }
 0x1df   :  { %v459_v36 = vrot.slane %v458_v16, 2  ;;  %v465_v38 = vrot.slane %v464_v13, 2  ;;  %v497_v58 = vadd.f32 %v496_v17, %v978_v8 }
 0x1e0   :  { %v417_v19 = vadd.f32 %v416_v25, %v412_v18  ;;  %v423_v20 = vadd.f32 %v422_v26, %v413_v23  ;;  %v431_v21 = vadd.f32 %v430_v27, %v429_v12  ;;  %v437_v22 = vadd.f32 %v436_v28, %v435_v24 }
 0x1e1   :  { %v446_v37 = vmax.f32 %v412_v18, %v416_v25  ;;  %v452_v39 = vmax.f32 %v413_v23, %v422_v26  ;;  %v460_v40 = vmax.f32 %v458_v16, %v459_v36  ;;  %v466_v41 = vmax.f32 %v464_v13, %v465_v38 }
 0x1e2   :  { %v418_v42 = vrot.slane %v417_v19, 2  ;;  %v424_v43 = vrot.slane %v423_v20, 2  ;;  %v432_v31 = vrot.slane %v431_v21, 1  ;;  %v438_v32 = vrot.slane %v437_v22, 1 }
 0x1e3   :  { %v447_v33 = vrot.slane %v446_v37, 2  ;;  %v453_v34 = vrot.slane %v452_v39, 2  ;;  %v461_v44 = vrot.slane %v460_v40, 1  ;;  %v467_v49 = vrot.slane %v466_v41, 1 }
 0x1e4   :  { %v419_v50 = vadd.f32 %v418_v42, %v417_v19  ;;  %v425_v59 = vadd.f32 %v424_v43, %v423_v20  ;;  %v433_v51 = vadd.f32 %v432_v31, %v431_v21  ;;  %v439_v52 = vadd.f32 %v438_v32, %v437_v22 }
 0x1e5   :  { %v448_v53 = vmax.f32 %v446_v37, %v447_v33  ;;  %v454_v54 = vmax.f32 %v452_v39, %v453_v34  ;;  %v462_v60 = vmax.f32 %v460_v40, %v461_v44  ;;  %v468_v1 = vmax.f32 %v466_v41, %v467_v49 }
 0x1e6   :  { %v420_v2 = vrot.slane %v419_v50, 1  ;;  %v426_v3 = vrot.slane %v425_v59, 1  ;;  %v443_v4 = vmul.f32 0.125, %v433_v51  ;;  %v444_v45 = vmul.f32 0.125, %v439_v52  ;;  %v600_v51 = vld [vmem:[%s1013_s0 + $0x18] sm:$0xff] }
 0x1e7   :  { %v449_v46 = vrot.slane %v448_v53, 1  ;;  %v455_v47 = vrot.slane %v454_v54, 1  ;;  %v522_v48 = vmul.f32 %v519_v35, %v462_v60  ;;  %v523_v5 = vmul.f32 %v519_v35, %v468_v1 }
 0x1e8   :  { %v421_v6 = vadd.f32 %v420_v2, %v419_v50  ;;  %v427_v9 = vadd.f32 %v426_v3, %v425_v59  ;;  %v516_v55 = vmul.f32 %v513_v30, %v443_v4  ;;  %v517_v56 = vmul.f32 %v513_v30, %v444_v45  ;;  %v599_v59 = vld [vmem:[%s1013_s0 + $0x10] sm:$0xff]  ;;  %v597_v2 = vld [vmem:[%s1013_s0] sm:$0xff]  ;;  %v598_v4 = vld [vmem:[%s1013_s0 + $0x8] sm:$0xff] }
 0x1e9   :  { %v450_v63 = vmax.f32 %v448_v53, %v449_v46  ;;  %v456_v0 = vmax.f32 %v454_v54, %v455_v47  ;;  %v533_v24 = vstv %s983_s21  ;;  %v490_v36 = vadd.f32 %v489_v14, %v976_v7 }
 0x1ea   :  { %v441_v11 = vmul.f32 0.125, %v421_v6  ;;  %v442_v18 = vmul.f32 0.125, %v427_v9  ;;  %v526_v23 = vadd.f32 %v522_v48, %v516_v55  ;;  %v527_v12 = vadd.f32 %v523_v5, %v517_v56 }
 0x1eb   :  { %v520_v16 = vmul.f32 %v519_v35, %v450_v63  ;;  %v521_v13 = vmul.f32 %v519_v35, %v456_v0  ;;  %v748_v44 = vmov 1983009808  }
 0x1ec   :  { %v514_v25 = vmul.f32 %v513_v30, %v441_v11  ;;  %v515_v26 = vmul.f32 %v513_v30, %v442_v18  ;;  %v530_v27 = vadd.f32 %v526_v23, %v504_v57  ;;  %v531_v28 = vadd.f32 %v527_v12, %v511_v62 }
 0x1ed   :  { %v568_v49 = vunpack.c.l.s4 %v748_v44 }
 0x1ee   :  { %v524_v61 = vadd.f32 %v520_v16, %v514_v25  ;;  %v525_v29 = vadd.f32 %v521_v13, %v515_v26  ;;  %v536_v15 = vadd.f32 %v533_v24, %v530_v27  ;;  %v537_v38 = vadd.f32 %v533_v24, %v531_v28 }
 0x1ef   :  { %v569_v50 = vunpack.c.0.s8 %v568_v49 }
 0x1f0   :  { %v528_v19 = vadd.f32 %v524_v61, %v490_v36  ;;  %v529_v20 = vadd.f32 %v525_v29, %v497_v58  ;;  %v540_v21 = vsub.f32 0.0, %v536_v15  ;;  %v541_v35 = vsub.f32 0.0, %v537_v38 }
 0x1f1   :  { %v572_v53 = vsub.s32 %v569_v50, %v825_v10 }
 0x1f2   :  { %v534_v22 = vadd.f32 %v533_v24, %v528_v19  ;;  %v535_v30 = vadd.f32 %v533_v24, %v529_v20  ;;  %v546_v37 = vmul.f32 1.442695, %v540_v21  ;;  %v548_v39 = vmul.f32 1.442695, %v541_v35 }
 0x1f4   :  { %v538_v40 = vsub.f32 0.0, %v534_v22  ;;  %v539_v41 = vsub.f32 0.0, %v535_v30  ;;  %672 = vpow2.f32 %v546_v37 }
 0x1f5   :  { %674 = vpow2.f32 %v548_v39 }
 0x1f6   :  { %v542_v7 = vmul.f32 1.442695, %v538_v40  ;;  %v544_v14 = vmul.f32 1.442695, %v539_v41 }
 0x1f8   :  { %676 = vpow2.f32 %v542_v7 }
 0x1f9   :  { %678 = vpow2.f32 %v544_v14 }
 0x201   :  { %v673_v8 = vpop.eup %672 }
 0x202   :  { %v675_v17 = vpop.eup %674  ;;  %v552_v42 = vadd.f32 1.0, %v673_v8 }
 0x203   :  { %v553_v43 = vadd.f32 1.0, %v675_v17 }
 0x204   :  { %680 = vrcp.f32 %v552_v42 }
 0x205   :  { %v677_v31 = vpop.eup %676  ;;  %682 = vrcp.f32 %v553_v43 }
 0x206   :  { %v679_v32 = vpop.eup %678  ;;  %v550_v33 = vadd.f32 1.0, %v677_v31 }
 0x207   :  { %v551_v34 = vadd.f32 1.0, %v679_v32 }
 0x208   :  { %684 = vrcp.f32 %v550_v33 }
 0x209   :  { %686 = vrcp.f32 %v551_v34 }
 0x211   :  { %v681_v52 = vpop.eup %680 }
 0x212   :  { %v683_v54 = vpop.eup %682  ;;  %v603_v60 = vmul.f32 %v681_v52, %v599_v59 }
 0x213   :  { %v574_v1 = vcombine.low %v681_v52, %v683_v54  ;;  %v604_v3 = vmul.f32 %v683_v54, %v600_v51 }
 0x214   :  { %607 = vst [vmem:[#allocation6 + $0x10] sm:$0xff] %v603_v60 }
 0x215   :  { %v685_v45 = vpop.eup %684  ;;  %v581_v46 = vrot.slane %v574_v1, %v572_v53  ;;  %608 = vst [vmem:[#allocation6 + $0x18] sm:$0xff] %v604_v3 }
 0x216   :  { %v687_v47 = vpop.eup %686  ;;  %v601_v10 = vmul.f32 %v685_v45, %v597_v2 }
 0x217   :  { %v566_v48 = vcombine.low %v685_v45, %v687_v47  ;;  %v602_v5 = vmul.f32 %v687_v47, %v598_v4  ;;  %v586_v9 = vrot.slane %v581_v46, 7 }
 0x218   :  { %605 = vst [vmem:[#allocation6] sm:$0xff] %v601_v10 }
 0x219   :  { %v573_v6 = vrot.slane %v566_v48, %v572_v53  ;;  %606 = vst [vmem:[#allocation6 + $0x8] sm:$0xff] %v602_v5 }
 0x21a   :  { %711 = shalt.err (!%p708_p9)
}
 0x21b   :  { %s751_s0 = smov 256   ;;  %s752_s12 = smov 16   ;;  %v588_v55 = vsel %vm587_vm1, %v586_v9, %v573_v6  ;;  %vm593_vm4 = vcmask 1047559  }
 0x21c   :  { %630 = dma.vmem_to_hbm [thread:$0]  %s625_s2, 512, %s1021_s8, [#allocation7], %s751_s0, %s751_s0, %s752_s12   ;;  %v590_v56 = vsel %vm589_vm2, %v586_v9, %v588_v55 }
 0x21d   :  { %v592_v57 = vsel %vm591_vm3, %v586_v9, %v590_v56  ;;  %s720_s6 = scalar_lea.vmem %s616_s10, 64  ;;  %p725_p11 = scmp.lt.s32.totalorder %s616_s10, %s616_s10 }
 0x21e   :  { %v594_v62 = vsel %vm593_vm4, %v586_v9, %v592_v57  ;;  %p721_p10 = scmp.ne.s32.totalorder %s616_s10, %s720_s6  ;;  %p726_p12 = scmp.lt.s32.totalorder %s720_s6, %s720_s6 }
 0x21f   :  { %596 = vst [vmem:[#allocation5] sm:$0xf] %v594_v62 }
 0x220   :  { %p727_p13 = por %p726_p12, %p725_p11 }
 0x222   :  { %p728_p0 = pnand %p727_p13, %p721_p10 }
 0x224   :  { %731 = shalt.err (!%p728_p0)
}
 0x225   :  { %618 = dma.vmem_to_hbm [thread:$0]  %s616_s10, 64, %s1020_s7, [#allocation3]  }
 0x226   :  { %742 = dma.done.wait [#allocation3], 64  }
 0x227   :  { %743 = vsyncadd [#allocation3], 4294967232 }
 0x228   :  { %744 = dma.done.wait [#allocation7], 512  }
 0x229   :  { %745 = vsyncadd [#allocation7], 4294966784 }
 0x22a   :  { %637 = vsyncpa [#allocation3], 1 }
 0x22b   :  { %638 = vsyncpa [#allocation7], 1 }
 0x22c   :  { %639 = vsyncpa [#allocation4], 1 }

</bundles_post_ra>
